<compile_context>
chip_gen: v5e
topology: v5e:2x2
jax: 0.10.0
libtpu: 0.0.40
codegen_flags: <defaults>
</compile_context>

<pallas_src>
import functools
import math

import jax
import jax.numpy as jnp
from jax.experimental import pallas as pl
from jax.experimental.pallas import tpu as pltpu

_LANE = 128


def _round_up(x, m):
    return ((x + m - 1) // m) * m


def _pdan_kernel(x_ref, kvh_ref, mask_ref, wqkv_ref, rel_ref, w1_ref, b1_ref,
                 o_ref, kvp_ref, *, dilation):
    d = dilation
    x = x_ref[0]                  # (C, T_tile)  input dtype
    m = mask_ref[0]               # (1, T_tile)
    wqkv = wqkv_ref[...]          # (3C, C)  rows: [Wq; Wk; Wv]
    rel = rel_ref[...]            # (C, 3)   f32
    w1 = w1_ref[...]              # (C, C)
    b1 = b1_ref[...]              # (C, 1)   f32

    C = wqkv.shape[1]
    T = x.shape[1]

    # One fused MXU matmul (single weight push): [q; k; v] = [Wq;Wk;Wv] @ x.
    # Operands stay in the input dtype (bf16 MXU path for bf16 activations),
    # accumulation in f32.
    qkv = jnp.dot(wqkv, x, preferred_element_type=jnp.float32)    # (3C, T)
    q = qkv[0:C]
    k = qkv[C:2 * C]
    v = qkv[2 * C:3 * C]

    # Halo-padded [k; v] scratch: center from the matmul result, the d edge
    # columns on each side from the precomputed halo input (zeros at sequence
    # edges reproduce F.pad semantics because the 1x1 convs have no bias).
    kvh = kvh_ref[0, 0]                                           # (2C, halo_w) f32
    kvp_ref[:, 0:d] = kvh[:, 0:d]
    kvp_ref[:, d:d + T] = qkv[C:3 * C]
    kvp_ref[:, d + T:d + T + d] = kvh[:, d:2 * d]

    kv_l = kvp_ref[:, 0:T]                   # taps at t - d (k rows then v rows)
    kv_r = kvp_ref[:, 2 * d:2 * d + T]       # taps at t + d
    k_l = kv_l[0:C]
    v_l = kv_l[C:2 * C]
    k_r = kv_r[0:C]
    v_r = kv_r[C:2 * C]

    # 3-tap softmax over {t-d, t, t+d}, numerically stabilized.
    s0 = q * k_l
    s1 = q * k
    s2 = q * k_r
    s_max = jnp.maximum(jnp.maximum(s0, s1), s2)
    e0 = jnp.exp(s0 - s_max)
    e1 = jnp.exp(s1 - s_max)
    e2 = jnp.exp(s2 - s_max)
    inv = pl.reciprocal(e0 + e1 + e2, approx=True)   # EUP vrcp; VALU stays free

    # Relative positional term is added per tap AFTER the zero halo (as in the
    # PyTorch reference), then attention + ReLU.
    v0 = v_l + rel[:, 0:1]
    v1 = v + rel[:, 1:2]
    v2 = v_r + rel[:, 2:3]
    att = jnp.maximum((e0 * v0 + e1 * v1 + e2 * v2) * inv, 0.0)

    # conv_1x1 (with bias) in the input dtype (keeps the bf16 MXU path),
    # f32 accumulation; then residual and mask.
    out = jnp.dot(w1, att.astype(w1.dtype), preferred_element_type=jnp.float32) + b1
    o_ref[0] = ((x + out) * m).astype(o_ref.dtype)


def pdan_block(x, mask, wq, wk, wv, rel, w1, b1, *, dilation):
    """x: (B, C, T), mask: (B, Cm, T). Returns (B, C, T) (eval-mode forward)."""
    B, C, T = x.shape
    assert C % 8 == 0, "channels must be a multiple of 8 (sublane tiling)"
    # (For bf16 activations, C % 16 == 0 avoids wasted sublanes in every vreg.)
    d = int(dilation)
    assert d >= 1
    dt = x.dtype
    itemsize = jnp.dtype(dt).itemsize

    # ---- generation-aware VMEM budget (v5e/v6e: 128 MiB, v7x: 64 MiB/TC) ----
    try:
        vmem_cap = int(pltpu.get_tpu_info().vmem_capacity_bytes)
    except Exception:
        vmem_cap = 64 << 20            # conservative fallback (v7x per-core)
    vmem_limit = max(min(vmem_cap - (20 << 20), 100 << 20), 32 << 20)

    # ---- tile selection: largest lane-dense time tile that fits the budget,
    #      never smaller than the dilation (halo comes from one neighbor tile),
    #      never (pointlessly) larger than the lane-padded sequence. -----------
    d_tile = _round_up(d, _LANE)
    halo_w = _round_up(2 * d, _LANE)

    def _vmem_need(tile):
        io = C * tile * itemsize * 2            # x tile + out tile
        io += 2 * C * halo_w * 4                # kv halo tile (f32)
        io += tile * itemsize                   # mask row
        weights = 4 * C * C * itemsize + (3 * C + C) * 4
        scratch = 2 * C * (tile + 2 * d) * 4    # halo-padded [k; v] scratch (f32)
        # double-buffer the per-step tensors; count weights twice (worst case,
        # i.e. the non-Buffered(1) fallback).
        return 2 * io + 2 * weights + scratch

    candidates = [c for c in (2048, 1024, 512, 256, 128) if c >= d_tile] or [d_tile]
    budget = int(0.8 * vmem_limit)
    best = candidates[-1]
    for cand in candidates:                     # largest first
        if _vmem_need(cand) <= budget:
            best = cand
            break
    tile = max(d_tile, min(best, _round_up(T, _LANE)))
    assert tile % _LANE == 0 and d <= tile

    t_pad = _round_up(T, tile)
    n_t = t_pad // tile

    # ---- host-side prep ------------------------------------------------------
    x_p = jnp.pad(x, ((0, 0), (0, 0), (0, t_pad - T)))
    mask_p = jnp.pad(mask[:, 0:1, :].astype(dt), ((0, 0), (0, 0), (0, t_pad - T)))

    # Per-tile halo k/v (d columns left and right of every tile), precomputed
    # with one small einsum so the kernel never pays a per-step 2d-wide MXU
    # weight push.  Zeros at the sequence edges == the reference's F.pad.
    xt = x_p.reshape(B, C, n_t, tile)
    left = jnp.pad(xt[:, :, :-1, tile - d:], ((0, 0), (0, 0), (1, 0), (0, 0)))
    right = jnp.pad(xt[:, :, 1:, :d], ((0, 0), (0, 0), (0, 1), (0, 0)))
    halo_x = jnp.concatenate([left, right], axis=-1)              # (B, C, nT, 2d)
    w_kv = jnp.concatenate([wk, wv], axis=0).astype(dt)           # (2C, C)
    kv_halo = jnp.einsum('oc,bcnh->bnoh', w_kv, halo_x,
                         preferred_element_type=jnp.float32)      # (B, nT, 2C, 2d)
    kv_halo = jnp.pad(kv_halo, ((0, 0), (0, 0), (0, 0), (0, halo_w - 2 * d)))

    w_qkv = jnp.concatenate([wq, wk, wv], axis=0).astype(dt)      # (3C, C)
    w1c = w1.astype(dt)
    relc = rel.astype(jnp.float32)
    b1c = b1.reshape(C, 1).astype(jnp.float32)

    kernel = functools.partial(_pdan_kernel, dilation=d)
    const2d = lambda b, j: (0, 0)

    def _call(single_buffer_weights):
        # Constant-index weights only need one resident copy; Buffered(1) halves
        # their VMEM footprint (matters at large C, esp. on v7x's 64 MiB VMEM).
        wkw = dict(pipeline_mode=pl.Buffered(1)) if single_buffer_weights else {}
        return pl.pallas_call(
            kernel,
            out_shape=jax.ShapeDtypeStruct((B, C, t_pad), dt),
            grid=(B, n_t),
            in_specs=[
                pl.BlockSpec((1, C, tile), lambda b, j: (b, 0, j)),             # x tile
                pl.BlockSpec((1, 1, 2 * C, halo_w), lambda b, j: (b, j, 0, 0)),  # kv halo
                pl.BlockSpec((1, 1, tile), lambda b, j: (b, 0, j)),             # mask row
                pl.BlockSpec((3 * C, C), const2d, **wkw),                       # [Wq;Wk;Wv]
                pl.BlockSpec((C, 3), const2d, **wkw),                           # rel_t
                pl.BlockSpec((C, C), const2d, **wkw),                           # W1
                pl.BlockSpec((C, 1), const2d, **wkw),                           # b1
            ],
            out_specs=pl.BlockSpec((1, C, tile), lambda b, j: (b, 0, j)),
            scratch_shapes=[
                pltpu.VMEM((2 * C, tile + 2 * d), jnp.float32),   # halo-padded [k; v]
            ],
            compiler_params=pltpu.CompilerParams(
                dimension_semantics=("parallel", "parallel"),
                vmem_limit_bytes=int(vmem_limit),
            ),
        )(x_p, kv_halo, mask_p, w_qkv, relc, w1c, b1c)

    try:
        out = _call(True)
    except Exception:
        # pipeline_mode=pl.Buffered(1) not supported on this build: fall back to
        # the (proven) default double-buffered weight specs.
        out = _call(False)
    return out[:, :, :T]


def _reference(x, mask, wq, wk, wv, rel, w1, b1, *, dilation):
    """Pure-JAX reference mirroring the PyTorch forward (eval mode)."""
    d = dilation
    B, C, T = x.shape
    q = jnp.einsum('oc,bct->bot', wq, x)
    k = jnp.einsum('oc,bct->bot', wk, x)
    v = jnp.einsum('oc,bct->bot', wv, x)
    kp = jnp.pad(k, ((0, 0), (0, 0), (d, d)))
    vp = jnp.pad(v, ((0, 0), (0, 0), (d, d)))
    k_st = jnp.stack([kp[..., 0:T], kp[..., d:d + T], kp[..., 2 * d:2 * d + T]], axis=-1)
    v_st = jnp.stack([vp[..., 0:T], vp[..., d:d + T], vp[..., 2 * d:2 * d + T]], axis=-1)
    v_st = v_st + rel[None, :, None, :]
    s = q[..., None] * k_st
    p = jax.nn.softmax(s, axis=-1)
    att = jnp.sum(p * v_st, axis=-1)
    out = jax.nn.relu(att)
    out = jnp.einsum('oc,bct->bot', w1, out) + b1[None, :, :]
    return (x + out) * mask[:, 0:1, :]


if __name__ == "__main__":
    def _run_case(key, B, C, T, dilation):
        kx, km, kq, kk, kv, kr, k1, kb = jax.random.split(key, 8)
        dtype = jnp.float32
        x = jax.random.normal(kx, (B, C, T), dtype)
        mask = (jax.random.uniform(km, (B, C, T)) > 0.3).astype(dtype)

        # DAL params: kaiming_normal_(mode='fan_out') -> std = sqrt(2 / C_out)
        std = math.sqrt(2.0 / C)
        wq = std * jax.random.normal(kq, (C, C), dtype)
        wk = std * jax.random.normal(kk, (C, C), dtype)
        wv = std * jax.random.normal(kv, (C, C), dtype)
        rel = jax.random.normal(kr, (C, 3), dtype)          # rel_t (C, 1, 3) squeezed

        # conv_1x1 default PyTorch init: uniform(-1/sqrt(fan_in), 1/sqrt(fan_in))
        bound = 1.0 / math.sqrt(C)
        w1 = jax.random.uniform(k1, (C, C), dtype, -bound, bound)
        b1 = jax.random.uniform(kb, (C, 1), dtype, -bound, bound)

        out = pdan_block(x, mask, wq, wk, wv, rel, w1, b1, dilation=dilation)
        out = jax.block_until_ready(out)
        ref = _reference(x, mask, wq, wk, wv, rel, w1, b1, dilation=dilation)
        assert out.shape == (B, C, T)
        # approx reciprocal on the EUP => slightly looser tolerance than exact f32.
        assert jnp.allclose(out, ref, rtol=1e-2, atol=1e-2), "mismatch vs reference"

    key = jax.random.PRNGKey(0)
    key_a, key_b, key_c = jax.random.split(key, 3)
    _run_case(key_a, B=2, C=8, T=16, dilation=1)       # tiny, single time tile
    _run_case(key_b, B=2, C=8, T=300, dilation=3)      # non-128 T, single large tile
    _run_case(key_c, B=2, C=16, T=2600, dilation=4)    # multi-tile: exercises the halo path

    print("KERNEL_OK")
</pallas_src>

<mosaic_0001>
module attributes {stable_mosaic.version = 11 : i64} {
  func.func @_pdan_kernel(%arg0: i32, %arg1: i32, %arg2: memref<1x8x128xf32, #tpu.memory_space<vmem>>, %arg3: memref<1x1x16x128xf32, #tpu.memory_space<vmem>>, %arg4: memref<1x1x128xf32, #tpu.memory_space<vmem>>, %arg5: memref<24x8xf32, #tpu.memory_space<vmem>>, %arg6: memref<8x3xf32, #tpu.memory_space<vmem>>, %arg7: memref<8x8xf32, #tpu.memory_space<vmem>>, %arg8: memref<8x1xf32, #tpu.memory_space<vmem>>, %arg9: memref<1x8x128xf32, #tpu.memory_space<vmem>>, %arg10: memref<16x130xf32, #tpu.memory_space<vmem>>) attributes {dimension_semantics = [#tpu.dimension_semantics<parallel>, #tpu.dimension_semantics<parallel>], iteration_bounds = array<i64: 2, 1>, scalar_prefetch = 0 : i64, scratch_operands = 1 : i64, tpu.core_type = #tpu.core_type<tc>, window_params = [{transform_indices = @transform_0, window_bounds = array<i64: 1, 8, 128>}, {transform_indices = @transform_1, window_bounds = array<i64: 1, 1, 16, 128>}, {transform_indices = @transform_2, window_bounds = array<i64: 1, 1, 128>}, {pipeline_mode = #tpu.pipeline_mode<synchronous>, transform_indices = @transform_3, window_bounds = array<i64: 24, 8>}, {pipeline_mode = #tpu.pipeline_mode<synchronous>, transform_indices = @transform_4, window_bounds = array<i64: 8, 3>}, {pipeline_mode = #tpu.pipeline_mode<synchronous>, transform_indices = @transform_5, window_bounds = array<i64: 8, 8>}, {pipeline_mode = #tpu.pipeline_mode<synchronous>, transform_indices = @transform_6, window_bounds = array<i64: 8, 1>}, {transform_indices = @transform_7, window_bounds = array<i64: 1, 8, 128>}]} {
    %c0 = arith.constant 0 : index
    %c0_0 = arith.constant 0 : index
    %c0_1 = arith.constant 0 : index
    %0 = vector.load %arg2[%c0, %c0_0, %c0_1] : memref<1x8x128xf32, #tpu.memory_space<vmem>>, vector<1x8x128xf32>
    %1 = vector.shape_cast %0 : vector<1x8x128xf32> to vector<8x128xf32>
    %c0_2 = arith.constant 0 : index
    %c0_3 = arith.constant 0 : index
    %c0_4 = arith.constant 0 : index
    %2 = vector.load %arg4[%c0_2, %c0_3, %c0_4] : memref<1x1x128xf32, #tpu.memory_space<vmem>>, vector<1x1x128xf32>
    %3 = vector.shape_cast %2 : vector<1x1x128xf32> to vector<1x128xf32>
    %c0_5 = arith.constant 0 : index
    %c0_6 = arith.constant 0 : index
    %4 = vector.load %arg5[%c0_5, %c0_6] : memref<24x8xf32, #tpu.memory_space<vmem>>, vector<24x8xf32>
    %c0_7 = arith.constant 0 : index
    %c0_8 = arith.constant 0 : index
    %5 = vector.load %arg6[%c0_7, %c0_8] : memref<8x3xf32, #tpu.memory_space<vmem>>, vector<8x3xf32>
    %c0_9 = arith.constant 0 : index
    %c0_10 = arith.constant 0 : index
    %6 = vector.load %arg7[%c0_9, %c0_10] : memref<8x8xf32, #tpu.memory_space<vmem>>, vector<8x8xf32>
    %c0_11 = arith.constant 0 : index
    %c0_12 = arith.constant 0 : index
    %7 = vector.load %arg8[%c0_11, %c0_12] : memref<8x1xf32, #tpu.memory_space<vmem>>, vector<8x1xf32>
    %cst = arith.constant dense<0.000000e+00> : vector<24x128xf32>
    %8 = tpu.matmul %4, %1, %cst {dimension_numbers = #tpu.dot_dimension_numbers<[1], [0], [0], [1], [0, 0, 1, 1], [], []>} : vector<24x8xf32>, vector<8x128xf32>, vector<24x128xf32> -> vector<24x128xf32>
    %9 = vector.extract_strided_slice %8 {offsets = [0, 0], sizes = [8, 128], strides = [1, 1]} : vector<24x128xf32> to vector<8x128xf32>
    %10 = vector.extract_strided_slice %8 {offsets = [8, 0], sizes = [8, 128], strides = [1, 1]} : vector<24x128xf32> to vector<8x128xf32>
    %11 = vector.extract_strided_slice %8 {offsets = [16, 0], sizes = [8, 128], strides = [1, 1]} : vector<24x128xf32> to vector<8x128xf32>
    %c0_13 = arith.constant 0 : index
    %c0_14 = arith.constant 0 : index
    %c0_15 = arith.constant 0 : index
    %c0_16 = arith.constant 0 : index
    %12 = vector.load %arg3[%c0_13, %c0_14, %c0_15, %c0_16] : memref<1x1x16x128xf32, #tpu.memory_space<vmem>>, vector<1x1x16x128xf32>
    %13 = vector.shape_cast %12 : vector<1x1x16x128xf32> to vector<16x128xf32>
    %14 = vector.extract_strided_slice %13 {offsets = [0, 0], sizes = [16, 1], strides = [1, 1]} : vector<16x128xf32> to vector<16x1xf32>
    %c0_17 = arith.constant 0 : index
    %c0_18 = arith.constant 0 : index
    %15 = vector.load %arg10[%c0_17, %c0_18] : memref<16x130xf32, #tpu.memory_space<vmem>>, vector<16x1xf32>
    tpu.vector_store %arg10[%c0_17, %c0_18], %14 {strides = array<i32>} : memref<16x130xf32, #tpu.memory_space<vmem>>, vector<16x1xf32>,
    %16 = vector.extract_strided_slice %8 {offsets = [8, 0], sizes = [16, 128], strides = [1, 1]} : vector<24x128xf32> to vector<16x128xf32>
    %c0_19 = arith.constant 0 : index
    %c1 = arith.constant 1 : index
    %17 = vector.load %arg10[%c0_19, %c1] : memref<16x130xf32, #tpu.memory_space<vmem>>, vector<16x128xf32>
    tpu.vector_store %arg10[%c0_19, %c1], %16 {strides = array<i32>} : memref<16x130xf32, #tpu.memory_space<vmem>>, vector<16x128xf32>,
    %18 = vector.extract_strided_slice %13 {offsets = [0, 1], sizes = [16, 1], strides = [1, 1]} : vector<16x128xf32> to vector<16x1xf32>
    %c0_20 = arith.constant 0 : index
    %c129 = arith.constant 129 : index
    %19 = vector.load %arg10[%c0_20, %c129] : memref<16x130xf32, #tpu.memory_space<vmem>>, vector<16x1xf32>
    tpu.vector_store %arg10[%c0_20, %c129], %18 {strides = array<i32>} : memref<16x130xf32, #tpu.memory_space<vmem>>, vector<16x1xf32>,
    %c0_21 = arith.constant 0 : index
    %c0_22 = arith.constant 0 : index
    %20 = vector.load %arg10[%c0_21, %c0_22] : memref<16x130xf32, #tpu.memory_space<vmem>>, vector<16x128xf32>
    %c0_23 = arith.constant 0 : index
    %c2 = arith.constant 2 : index
    %21 = vector.load %arg10[%c0_23, %c2] : memref<16x130xf32, #tpu.memory_space<vmem>>, vector<16x128xf32>
    %22 = vector.extract_strided_slice %20 {offsets = [0, 0], sizes = [8, 128], strides = [1, 1]} : vector<16x128xf32> to vector<8x128xf32>
    %23 = vector.extract_strided_slice %20 {offsets = [8, 0], sizes = [8, 128], strides = [1, 1]} : vector<16x128xf32> to vector<8x128xf32>
    %24 = vector.extract_strided_slice %21 {offsets = [0, 0], sizes = [8, 128], strides = [1, 1]} : vector<16x128xf32> to vector<8x128xf32>
    %25 = vector.extract_strided_slice %21 {offsets = [8, 0], sizes = [8, 128], strides = [1, 1]} : vector<16x128xf32> to vector<8x128xf32>
    %26 = arith.mulf %9, %22 : vector<8x128xf32>
    %27 = arith.mulf %9, %10 : vector<8x128xf32>
    %28 = arith.mulf %9, %24 : vector<8x128xf32>
    %29 = arith.maximumf %26, %27 : vector<8x128xf32>
    %30 = arith.maximumf %29, %28 : vector<8x128xf32>
    %31 = arith.subf %26, %30 : vector<8x128xf32>
    %32 = math.exp %31 : vector<8x128xf32>
    %33 = arith.subf %27, %30 : vector<8x128xf32>
    %34 = math.exp %33 : vector<8x128xf32>
    %35 = arith.subf %28, %30 : vector<8x128xf32>
    %36 = math.exp %35 : vector<8x128xf32>
    %37 = arith.addf %32, %34 : vector<8x128xf32>
    %38 = arith.addf %37, %36 : vector<8x128xf32>
    %39 = tpu.reciprocal %38 {approx = true} : vector<8x128xf32> -> vector<8x128xf32>
    %40 = vector.extract_strided_slice %5 {offsets = [0, 0], sizes = [8, 1], strides = [1, 1]} : vector<8x3xf32> to vector<8x1xf32>
    %41 = vector.broadcast %40 : vector<8x1xf32> to vector<8x128xf32>
    %42 = arith.addf %23, %41 : vector<8x128xf32>
    %43 = vector.extract_strided_slice %5 {offsets = [0, 1], sizes = [8, 1], strides = [1, 1]} : vector<8x3xf32> to vector<8x1xf32>
    %44 = vector.broadcast %43 : vector<8x1xf32> to vector<8x128xf32>
    %45 = arith.addf %11, %44 : vector<8x128xf32>
    %46 = vector.extract_strided_slice %5 {offsets = [0, 2], sizes = [8, 1], strides = [1, 1]} : vector<8x3xf32> to vector<8x1xf32>
    %47 = vector.broadcast %46 : vector<8x1xf32> to vector<8x128xf32>
    %48 = arith.addf %25, %47 : vector<8x128xf32>
    %49 = arith.mulf %32, %42 : vector<8x128xf32>
    %50 = arith.mulf %34, %45 : vector<8x128xf32>
    %51 = arith.addf %49, %50 : vector<8x128xf32>
    %52 = arith.mulf %36, %48 : vector<8x128xf32>
    %53 = arith.addf %51, %52 : vector<8x128xf32>
    %54 = arith.mulf %53, %39 : vector<8x128xf32>
    %cst_24 = arith.constant 0.000000e+00 : f32
    %55 = vector.broadcast %cst_24 : f32 to vector<8x128xf32>
    %56 = arith.maximumf %54, %55 : vector<8x128xf32>
    %cst_25 = arith.constant dense<0.000000e+00> : vector<8x128xf32>
    %57 = tpu.matmul %6, %56, %cst_25 {dimension_numbers = #tpu.dot_dimension_numbers<[1], [0], [0], [1], [0, 0, 1, 1], [], []>} : vector<8x8xf32>, vector<8x128xf32>, vector<8x128xf32> -> vector<8x128xf32>
    %58 = vector.broadcast %7 : vector<8x1xf32> to vector<8x128xf32>
    %59 = arith.addf %57, %58 : vector<8x128xf32>
    %60 = arith.addf %1, %59 : vector<8x128xf32>
    %61 = vector.broadcast %3 : vector<1x128xf32> to vector<8x128xf32>
    %62 = arith.mulf %60, %61 : vector<8x128xf32>
    %c0_26 = arith.constant 0 : index
    %c0_27 = arith.constant 0 : index
    %c0_28 = arith.constant 0 : index
    %63 = vector.load %arg9[%c0_26, %c0_27, %c0_28] : memref<1x8x128xf32, #tpu.memory_space<vmem>>, vector<1x8x128xf32>
    %64 = vector.shape_cast %63 : vector<1x8x128xf32> to vector<8x128xf32>
    %65 = vector.shape_cast %62 : vector<8x128xf32> to vector<1x8x128xf32>
    tpu.vector_store %arg9[%c0_26, %c0_27, %c0_28], %65 {strides = array<i32>} : memref<1x8x128xf32, #tpu.memory_space<vmem>>, vector<1x8x128xf32>,
    return
  }
  func.func @transform_0(%arg0: i32, %arg1: i32) -> (i32, i32, i32) {
    %c0_i32 = arith.constant 0 : i32
    %c0_i32_0 = arith.constant 0 : i32
    return %arg0, %c0_i32, %arg1 : i32, i32, i32
  }
  func.func @transform_1(%arg0: i32, %arg1: i32) -> (i32, i32, i32, i32) {
    %c0_i32 = arith.constant 0 : i32
    %c0_i32_0 = arith.constant 0 : i32
    %c0_i32_1 = arith.constant 0 : i32
    return %arg0, %arg1, %c0_i32, %c0_i32_0 : i32, i32, i32, i32
  }
  func.func @transform_2(%arg0: i32, %arg1: i32) -> (i32, i32, i32) {
    %c0_i32 = arith.constant 0 : i32
    %c0_i32_0 = arith.constant 0 : i32
    return %arg0, %c0_i32, %arg1 : i32, i32, i32
  }
  func.func @transform_3(%arg0: i32, %arg1: i32) -> (i32, i32) {
    %c0_i32 = arith.constant 0 : i32
    %c0_i32_0 = arith.constant 0 : i32
    %c0_i32_1 = arith.constant 0 : i32
    return %c0_i32, %c0_i32_0 : i32, i32
  }
  func.func @transform_4(%arg0: i32, %arg1: i32) -> (i32, i32) {
    %c0_i32 = arith.constant 0 : i32
    %c0_i32_0 = arith.constant 0 : i32
    %c0_i32_1 = arith.constant 0 : i32
    return %c0_i32, %c0_i32_0 : i32, i32
  }
  func.func @transform_5(%arg0: i32, %arg1: i32) -> (i32, i32) {
    %c0_i32 = arith.constant 0 : i32
    %c0_i32_0 = arith.constant 0 : i32
    %c0_i32_1 = arith.constant 0 : i32
    return %c0_i32, %c0_i32_0 : i32, i32
  }
  func.func @transform_6(%arg0: i32, %arg1: i32) -> (i32, i32) {
    %c0_i32 = arith.constant 0 : i32
    %c0_i32_0 = arith.constant 0 : i32
    %c0_i32_1 = arith.constant 0 : i32
    return %c0_i32, %c0_i32_0 : i32, i32
  }
  func.func @transform_7(%arg0: i32, %arg1: i32) -> (i32, i32, i32) {
    %c0_i32 = arith.constant 0 : i32
    %c0_i32_0 = arith.constant 0 : i32
    return %arg0, %c0_i32, %arg1 : i32, i32, i32
  }
}

module attributes {stable_mosaic.version = 11 : i64} {
  func.func @_pdan_kernel(%arg0: i32, %arg1: i32, %arg2: memref<1x8x128xf32, #tpu.memory_space<vmem>>, %arg3: memref<1x1x16x128xf32, #tpu.memory_space<vmem>>, %arg4: memref<1x1x128xf32, #tpu.memory_space<vmem>>, %arg5: memref<24x8xf32, #tpu.memory_space<vmem>>, %arg6: memref<8x3xf32, #tpu.memory_space<vmem>>, %arg7: memref<8x8xf32, #tpu.memory_space<vmem>>, %arg8: memref<8x1xf32, #tpu.memory_space<vmem>>, %arg9: memref<1x8x128xf32, #tpu.memory_space<vmem>>, %arg10: memref<16x130xf32, #tpu.memory_space<vmem>>) attributes {dimension_semantics = [#tpu.dimension_semantics<parallel>, #tpu.dimension_semantics<parallel>], iteration_bounds = array<i64: 2, 1>, scalar_prefetch = 0 : i64, scratch_operands = 1 : i64, tpu.core_type = #tpu.core_type<tc>, window_params = [{transform_indices = @transform_0, window_bounds = array<i64: 1, 8, 128>}, {transform_indices = @transform_1, window_bounds = array<i64: 1, 1, 16, 128>}, {transform_indices = @transform_2, window_bounds = array<i64: 1, 1, 128>}, {pipeline_mode = #tpu.pipeline_mode<synchronous>, transform_indices = @transform_3, window_bounds = array<i64: 24, 8>}, {pipeline_mode = #tpu.pipeline_mode<synchronous>, transform_indices = @transform_4, window_bounds = array<i64: 8, 3>}, {pipeline_mode = #tpu.pipeline_mode<synchronous>, transform_indices = @transform_5, window_bounds = array<i64: 8, 8>}, {pipeline_mode = #tpu.pipeline_mode<synchronous>, transform_indices = @transform_6, window_bounds = array<i64: 8, 1>}, {transform_indices = @transform_7, window_bounds = array<i64: 1, 8, 128>}]} {
    %c0 = arith.constant 0 : index
    %c0_0 = arith.constant 0 : index
    %c0_1 = arith.constant 0 : index
    %0 = vector.load %arg2[%c0, %c0_0, %c0_1] : memref<1x8x128xf32, #tpu.memory_space<vmem>>, vector<1x8x128xf32>
    %1 = vector.shape_cast %0 : vector<1x8x128xf32> to vector<8x128xf32>
    %c0_2 = arith.constant 0 : index
    %c0_3 = arith.constant 0 : index
    %c0_4 = arith.constant 0 : index
    %2 = vector.load %arg4[%c0_2, %c0_3, %c0_4] : memref<1x1x128xf32, #tpu.memory_space<vmem>>, vector<1x1x128xf32>
    %3 = vector.shape_cast %2 : vector<1x1x128xf32> to vector<1x128xf32>
    %c0_5 = arith.constant 0 : index
    %c0_6 = arith.constant 0 : index
    %4 = vector.load %arg5[%c0_5, %c0_6] : memref<24x8xf32, #tpu.memory_space<vmem>>, vector<24x8xf32>
    %c0_7 = arith.constant 0 : index
    %c0_8 = arith.constant 0 : index
    %5 = vector.load %arg6[%c0_7, %c0_8] : memref<8x3xf32, #tpu.memory_space<vmem>>, vector<8x3xf32>
    %c0_9 = arith.constant 0 : index
    %c0_10 = arith.constant 0 : index
    %6 = vector.load %arg7[%c0_9, %c0_10] : memref<8x8xf32, #tpu.memory_space<vmem>>, vector<8x8xf32>
    %c0_11 = arith.constant 0 : index
    %c0_12 = arith.constant 0 : index
    %7 = vector.load %arg8[%c0_11, %c0_12] : memref<8x1xf32, #tpu.memory_space<vmem>>, vector<8x1xf32>
    %cst = arith.constant dense<0.000000e+00> : vector<24x128xf32>
    %8 = tpu.matmul %4, %1, %cst {dimension_numbers = #tpu.dot_dimension_numbers<[1], [0], [0], [1], [0, 0, 1, 1], [], []>} : vector<24x8xf32>, vector<8x128xf32>, vector<24x128xf32> -> vector<24x128xf32>
    %9 = vector.extract_strided_slice %8 {offsets = [0, 0], sizes = [8, 128], strides = [1, 1]} : vector<24x128xf32> to vector<8x128xf32>
    %10 = vector.extract_strided_slice %8 {offsets = [8, 0], sizes = [8, 128], strides = [1, 1]} : vector<24x128xf32> to vector<8x128xf32>
    %11 = vector.extract_strided_slice %8 {offsets = [16, 0], sizes = [8, 128], strides = [1, 1]} : vector<24x128xf32> to vector<8x128xf32>
    %c0_13 = arith.constant 0 : index
    %c0_14 = arith.constant 0 : index
    %c0_15 = arith.constant 0 : index
    %c0_16 = arith.constant 0 : index
    %12 = vector.load %arg3[%c0_13, %c0_14, %c0_15, %c0_16] : memref<1x1x16x128xf32, #tpu.memory_space<vmem>>, vector<1x1x16x128xf32>
    %13 = vector.shape_cast %12 : vector<1x1x16x128xf32> to vector<16x128xf32>
    %14 = vector.extract_strided_slice %13 {offsets = [0, 0], sizes = [16, 1], strides = [1, 1]} : vector<16x128xf32> to vector<16x1xf32>
    %c0_17 = arith.constant 0 : index
    %c0_18 = arith.constant 0 : index
    %15 = vector.load %arg10[%c0_17, %c0_18] : memref<16x130xf32, #tpu.memory_space<vmem>>, vector<16x1xf32>
    tpu.vector_store %arg10[%c0_17, %c0_18], %14 {strides = array<i32>} : memref<16x130xf32, #tpu.memory_space<vmem>>, vector<16x1xf32>,
    %16 = vector.extract_strided_slice %8 {offsets = [8, 0], sizes = [16, 128], strides = [1, 1]} : vector<24x128xf32> to vector<16x128xf32>
    %c0_19 = arith.constant 0 : index
    %c1 = arith.constant 1 : index
    %17 = vector.load %arg10[%c0_19, %c1] : memref<16x130xf32, #tpu.memory_space<vmem>>, vector<16x128xf32>
    tpu.vector_store %arg10[%c0_19, %c1], %16 {strides = array<i32>} : memref<16x130xf32, #tpu.memory_space<vmem>>, vector<16x128xf32>,
    %18 = vector.extract_strided_slice %13 {offsets = [0, 1], sizes = [16, 1], strides = [1, 1]} : vector<16x128xf32> to vector<16x1xf32>
    %c0_20 = arith.constant 0 : index
    %c129 = arith.constant 129 : index
    %19 = vector.load %arg10[%c0_20, %c129] : memref<16x130xf32, #tpu.memory_space<vmem>>, vector<16x1xf32>
    tpu.vector_store %arg10[%c0_20, %c129], %18 {strides = array<i32>} : memref<16x130xf32, #tpu.memory_space<vmem>>, vector<16x1xf32>,
    %c0_21 = arith.constant 0 : index
    %c0_22 = arith.constant 0 : index
    %20 = vector.load %arg10[%c0_21, %c0_22] : memref<16x130xf32, #tpu.memory_space<vmem>>, vector<16x128xf32>
    %c0_23 = arith.constant 0 : index
    %c2 = arith.constant 2 : index
    %21 = vector.load %arg10[%c0_23, %c2] : memref<16x130xf32, #tpu.memory_space<vmem>>, vector<16x128xf32>
    %22 = vector.extract_strided_slice %20 {offsets = [0, 0], sizes = [8, 128], strides = [1, 1]} : vector<16x128xf32> to vector<8x128xf32>
    %23 = vector.extract_strided_slice %20 {offsets = [8, 0], sizes = [8, 128], strides = [1, 1]} : vector<16x128xf32> to vector<8x128xf32>
    %24 = vector.extract_strided_slice %21 {offsets = [0, 0], sizes = [8, 128], strides = [1, 1]} : vector<16x128xf32> to vector<8x128xf32>
    %25 = vector.extract_strided_slice %21 {offsets = [8, 0], sizes = [8, 128], strides = [1, 1]} : vector<16x128xf32> to vector<8x128xf32>
    %26 = arith.mulf %9, %22 : vector<8x128xf32>
    %27 = arith.mulf %9, %10 : vector<8x128xf32>
    %28 = arith.mulf %9, %24 : vector<8x128xf32>
    %29 = arith.maximumf %26, %27 : vector<8x128xf32>
    %30 = arith.maximumf %29, %28 : vector<8x128xf32>
    %31 = arith.subf %26, %30 : vector<8x128xf32>
    %32 = math.exp %31 : vector<8x128xf32>
    %33 = arith.subf %27, %30 : vector<8x128xf32>
    %34 = math.exp %33 : vector<8x128xf32>
    %35 = arith.subf %28, %30 : vector<8x128xf32>
    %36 = math.exp %35 : vector<8x128xf32>
    %37 = arith.addf %32, %34 : vector<8x128xf32>
    %38 = arith.addf %37, %36 : vector<8x128xf32>
    %39 = tpu.reciprocal %38 {approx = true} : vector<8x128xf32> -> vector<8x128xf32>
    %40 = vector.extract_strided_slice %5 {offsets = [0, 0], sizes = [8, 1], strides = [1, 1]} : vector<8x3xf32> to vector<8x1xf32>
    %41 = vector.broadcast %40 : vector<8x1xf32> to vector<8x128xf32>
    %42 = arith.addf %23, %41 : vector<8x128xf32>
    %43 = vector.extract_strided_slice %5 {offsets = [0, 1], sizes = [8, 1], strides = [1, 1]} : vector<8x3xf32> to vector<8x1xf32>
    %44 = vector.broadcast %43 : vector<8x1xf32> to vector<8x128xf32>
    %45 = arith.addf %11, %44 : vector<8x128xf32>
    %46 = vector.extract_strided_slice %5 {offsets = [0, 2], sizes = [8, 1], strides = [1, 1]} : vector<8x3xf32> to vector<8x1xf32>
    %47 = vector.broadcast %46 : vector<8x1xf32> to vector<8x128xf32>
    %48 = arith.addf %25, %47 : vector<8x128xf32>
    %49 = arith.mulf %32, %42 : vector<8x128xf32>
    %50 = arith.mulf %34, %45 : vector<8x128xf32>
    %51 = arith.addf %49, %50 : vector<8x128xf32>
    %52 = arith.mulf %36, %48 : vector<8x128xf32>
    %53 = arith.addf %51, %52 : vector<8x128xf32>
    %54 = arith.mulf %53, %39 : vector<8x128xf32>
    %cst_24 = arith.constant 0.000000e+00 : f32
    %55 = vector.broadcast %cst_24 : f32 to vector<8x128xf32>
    %56 = arith.maximumf %54, %55 : vector<8x128xf32>
    %cst_25 = arith.constant dense<0.000000e+00> : vector<8x128xf32>
    %57 = tpu.matmul %6, %56, %cst_25 {dimension_numbers = #tpu.dot_dimension_numbers<[1], [0], [0], [1], [0, 0, 1, 1], [], []>} : vector<8x8xf32>, vector<8x128xf32>, vector<8x128xf32> -> vector<8x128xf32>
    %58 = vector.broadcast %7 : vector<8x1xf32> to vector<8x128xf32>
    %59 = arith.addf %57, %58 : vector<8x128xf32>
    %60 = arith.addf %1, %59 : vector<8x128xf32>
    %61 = vector.broadcast %3 : vector<1x128xf32> to vector<8x128xf32>
    %62 = arith.mulf %60, %61 : vector<8x128xf32>
    %c0_26 = arith.constant 0 : index
    %c0_27 = arith.constant 0 : index
    %c0_28 = arith.constant 0 : index
    %63 = vector.load %arg9[%c0_26, %c0_27, %c0_28] : memref<1x8x128xf32, #tpu.memory_space<vmem>>, vector<1x8x128xf32>
    %64 = vector.shape_cast %63 : vector<1x8x128xf32> to vector<8x128xf32>
    %65 = vector.shape_cast %62 : vector<8x128xf32> to vector<1x8x128xf32>
    tpu.vector_store %arg9[%c0_26, %c0_27, %c0_28], %65 {strides = array<i32>} : memref<1x8x128xf32, #tpu.memory_space<vmem>>, vector<1x8x128xf32>,
    return
  }
  func.func @transform_0(%arg0: i32, %arg1: i32) -> (i32, i32, i32) {
    %c0_i32 = arith.constant 0 : i32
    %c0_i32_0 = arith.constant 0 : i32
    return %arg0, %c0_i32, %arg1 : i32, i32, i32
  }
  func.func @transform_1(%arg0: i32, %arg1: i32) -> (i32, i32, i32, i32) {
    %c0_i32 = arith.constant 0 : i32
    %c0_i32_0 = arith.constant 0 : i32
    %c0_i32_1 = arith.constant 0 : i32
    return %arg0, %arg1, %c0_i32, %c0_i32_0 : i32, i32, i32, i32
  }
  func.func @transform_2(%arg0: i32, %arg1: i32) -> (i32, i32, i32) {
    %c0_i32 = arith.constant 0 : i32
    %c0_i32_0 = arith.constant 0 : i32
    return %arg0, %c0_i32, %arg1 : i32, i32, i32
  }
  func.func @transform_3(%arg0: i32, %arg1: i32) -> (i32, i32) {
    %c0_i32 = arith.constant 0 : i32
    %c0_i32_0 = arith.constant 0 : i32
    %c0_i32_1 = arith.constant 0 : i32
    return %c0_i32, %c0_i32_0 : i32, i32
  }
  func.func @transform_4(%arg0: i32, %arg1: i32) -> (i32, i32) {
    %c0_i32 = arith.constant 0 : i32
    %c0_i32_0 = arith.constant 0 : i32
    %c0_i32_1 = arith.constant 0 : i32
    return %c0_i32, %c0_i32_0 : i32, i32
  }
  func.func @transform_5(%arg0: i32, %arg1: i32) -> (i32, i32) {
    %c0_i32 = arith.constant 0 : i32
    %c0_i32_0 = arith.constant 0 : i32
    %c0_i32_1 = arith.constant 0 : i32
    return %c0_i32, %c0_i32_0 : i32, i32
  }
  func.func @transform_6(%arg0: i32, %arg1: i32) -> (i32, i32) {
    %c0_i32 = arith.constant 0 : i32
    %c0_i32_0 = arith.constant 0 : i32
    %c0_i32_1 = arith.constant 0 : i32
    return %c0_i32, %c0_i32_0 : i32, i32
  }
  func.func @transform_7(%arg0: i32, %arg1: i32) -> (i32, i32, i32) {
    %c0_i32 = arith.constant 0 : i32
    %c0_i32_0 = arith.constant 0 : i32
    return %arg0, %c0_i32, %arg1 : i32, i32, i32
  }
}

</mosaic_0001>

<bundles_post_ra>
// kernel: tpu_custom_call.1
= control target key start
LH: loop header
LB: loop body
LE: loop exit
PB: predicated region body
PF: predicated region fallthrough
CT: control target
= control target key end

     0   :  { %12 = vsyncpa [#allocation4], 0  ;;  %s1100_s0 = inlined_call_operand.hbm [shape: f32[2,8,128], index: 0, kind: input, shape index: {}]   ;;  %s1101_s1 = inlined_call_operand.vmem [shape: f32[2,1,16,128], index: 1, kind: input, shape index: {}]   ;;  %s1102_s2 = inlined_call_operand.vmem [shape: f32[2,1,128], index: 2, kind: input, shape index: {}]   ;;  %s1103_s3 = inlined_call_operand.vmem [shape: f32[24,8], index: 3, kind: input, shape index: {}]   ;;  %s1104_s4 = inlined_call_operand.vmem [shape: f32[8,3], index: 4, kind: input, shape index: {}]   ;;  %s1105_s5 = inlined_call_operand.vmem [shape: f32[8,8], index: 5, kind: input, shape index: {}]   ;;  %s1106_s6 = inlined_call_operand.vmem [shape: f32[8,1], index: 6, kind: input, shape index: {}]   ;;  %s1107_s7 = inlined_call_operand.hbm [shape: f32[2,8,128], index: 7, kind: output, shape index: {}]  }
   0x1   :  { %14 = vsyncpa [#allocation4 + $0x1], 0 }
   0x2   :  { %15 = vsyncpa [#allocation5], 0 }
   0x3   :  { %17 = vsyncpa [#allocation5 + $0x1], 0  ;;  %s925_s24 = smov 0   ;;  %s927_s25 = smov 0  }
   0x4   :  { %s929_s26 = smov 0   ;;  %s931_s27 = smov 0  }
   0x5   :  { %s933_s28 = smov 0   ;;  %s935_s29 = smov 0  }
   0x6 LB: > { %s663_s30 = sadd.s32 4294967295, %s878_s29   ;;  %s664_s8 = sadd.s32 4294967294, %s878_s29   ;;  %s878_s29 = sphi %s935_s29, %s23_s29   ;;  %s874_s28 = sphi %s933_s28, %s1116_s28   ;;  %s870_s27 = sphi %s931_s27, %s1115_s27   ;;  %s866_s26 = sphi %s929_s26, %s1114_s26   ;;  %s862_s25 = sphi %s927_s25, %s1113_s25   ;;  %s858_s24 = sphi %s925_s24, %s1112_s24  }
   0x7   : > { %s35_s9 = sadd.s32 1, %s874_s28  ;;  %s44_s10 = sadd.s32 1, %s866_s26 }
   0x8   : > { %p37_p0 = scmp.ge.s32.totalorder %s35_s9, 2  ;;  %p51_p1 = scmp.ne.s32.totalorder %s866_s26, %s862_s25 }
   0x9   : > { %p52_p2 = scmp.eq.s32.totalorder %s878_s29, 0  ;;  %p57_p3 = scmp.ne.s32.totalorder %s862_s25, %s858_s24 }
   0xa   : > { %s1118_s9 = smov (%p37_p0, %s35_s9), 0  ;;  %p58_p5 = scmp.eq.s32.totalorder %s663_s30, 0 }
   0xb   : > { %p966_p4 = por %p52_p2, %p51_p1  ;;  %s39_s12 = ssub.s32 %s874_s28, %s1118_s9 }
   0xc   : > { %p223_p6 = scmp.eq.s32.totalorder %s663_s30, 1  ;;  %p42_p7 = scmp.eq.s32.totalorder %s39_s12, 0 }
   0xd   : > { %p972_p8 = por %p58_p5, %p57_p3  ;;  %p229_p10 = scmp.eq.s32.totalorder %s664_s8, 1 }
   0xe   : > { %p976_p9 = por %p223_p6, %p51_p1  ;;  %p666_p12 = scmp.ge.s32.totalorder %s878_s29, 2 }
   0xf   : > { %s981_s15 = scalar_select %p42_p7, %s866_s26, %s44_s10  }
  0x10   : > { %p983_p11 = por %p229_p10, %p57_p3  ;;  %p697_p13 = scmp.lt.s32.totalorder %s878_s29, 2 }
  0x11   : > { %s261_s17 = sand.u32 1, %s866_s26   ;;  %s668_s19 = sshll.u32 %s874_s28, 3 }
  0x12   : > { %s667_s18 = sshll.u32 %s261_s17, 3  ;;  %s270_s22 = scalar_lea.hbm %s1100_s0, %s668_s19 }
  0x13   : > { %s265_s23 = scalar_lea.vmem [#allocation3], %s667_s18  ;;  %s272_s12 = sshll.u32 %s270_s22, 4  ;;  %s273_s12 = int_to_ptr.hbm [resolvable:$true] %s272_s12 }
  0x14   : > { %s274_s30 = sshll.u32 %s265_s23, 4  ;;  %p690_p0 = pnand %p697_p13, %p966_p4  ;;  %s275_s30 = int_to_ptr.vmem [resolvable:$true] %s274_s30 }
  0x15   : > { %p669_p1 = scmp.ge.s32.totalorder %s878_s29, 1  ;;  %p300_p2 = scmp.lt.s32.totalorder %s878_s29, 3 }
  0x16   : > { %s262_s8 = scalar_lea.sflag [#allocation4], %s261_s17 }
  0x17   : > { %692 = dma.hbm_to_vmem [thread:$0]  (!%p690_p0), %s273_s12, 128, %s275_s30, %s262_s8  }
  0x18   : > { %p301_p3 = pnand %p669_p1, %p300_p2 }
  0x19   : > { %s999_s10 = sand.u32 (!%p301_p3), 1, %s862_s25  }
  0x1a   : > { %304 = sbr.rel (%p301_p3) target bundleno = 572 (0x23c), region = 48  ;;  %s670_s18 = sshll.u32 (!%p301_p3), %s999_s10, 3 }
  0x1b   : > { %s307_s19 = scalar_lea.sflag (!%p301_p3), [#allocation4], %s999_s10  ;;  %s310_s20 = scalar_lea.vmem (!%p301_p3), [#allocation3], %s670_s18 }
  0x1f   : > { %849 = dma.done.wait (%p972_p8), %s307_s19, 128  }
  0x20   : > { %851 = vsyncadd (%p972_p8), %s307_s19, 4294967168  ;;  %vm380_vm0 = vcmask 64512   ;;  %v1009_v0 = vld [vmem:[%s310_s20] sm:$0xff]  ;;  %v376_v3 = vld [vmem:[%s1103_s3 + $0x10] sm:$0xff]  ;;  %p357_p4 = scmp.lt.s32.totalorder %s870_s27, 1  ;;  %v880_v5 = vmov 2  }
  0x21   : > { %v375_v1 = vld [vmem:[%s1103_s3 + $0x8] sm:$0xff]  ;;  %v374_v2 = vld [vmem:[%s1103_s3] sm:$0xff]  ;;  %683 = vmatpush.msra.mxu2 %v1009_v0  ;;  %405 = vmatpush.msra.mxu0 %v1009_v0  ;;  %v881_v6 = vmov 1   ;;  %vm418_vm1 = vcmask 7168   ;;  %s882_s21 = smov 1   ;;  %v883_v11 = vmov 0  }
  0x22   : > { %675 = vmatmul.msk.f32.vlgmr.msra.gmra.mxu2 %vm380_vm0, %v375_v1  ;;  %674 = vmatmul.msk.f32.vlgmr.msra.gmra.mxu0 %vm380_vm0, %v374_v2  ;;  %s1028_s30 = scalar_select %p357_p4, %s870_s27, 1  ;;  %v377_v4 = vld [vmem:[%s1104_s4] sm:$0xff]  ;;  %vm429_vm2 = vcmask 1047560   ;;  %vm434_vm3 = vcmask 15368   ;;  %vm449_vm4 = vcmask 1031168  }
  0x23   : > { %684 = vmatpush.msra.mxu3 %v1009_v0  ;;  %752 = vset.pattern.permute.xlu1 %v880_v5  ;;  %s884_s22 = smov 126   ;;  %v379_v29 = vld [vmem:[%s1106_s6] sm:$0xff] }
  0x24   : > { %676 = vmatmul.msk.f32.vlgmr.msra.gmra.mxu3 %vm380_vm0, %v376_v3  ;;  %754 = vset.pattern.permute.xlu0 %v881_v6  ;;  %s682_s19 = sshll.u32 %s1028_s30, 4  ;;  %s371_s12 = scalar_lea.vmem %s1102_s2, %s1028_s30  ;;  %v378_v57 = vld [vmem:[%s1105_s5] sm:$0xff] }
  0x25   : > { %479 = vperm.xlu1 %752, %v377_v4   ;;  %s365_s17 = scalar_lea.vmem %s1101_s1, %s682_s19  ;;  %753 = vset.pattern.permute.xlu2 %v883_v11  ;;  %v757_v61 = vld [vmem:[%s371_s12] ss:$0 sm:$0xff]  ;;  %s356_s19 = scalar_lea.vmem [#allocation6], %s670_s18 }
  0x26   : > { %v416_v7 = vld [vmem:[%s365_s17] sm:$0xff]  ;;  %v417_v10 = vld [vmem:[%s365_s17 + $0x8] sm:$0xff]  ;;  %s679_s17 = sshll.u32 %s870_s27, 3  ;;  %s547_s20 = sshll.u32 %s356_s19, 4  ;;  %s548_s20 = int_to_ptr.vmem [resolvable:$true] %s547_s20 }
  0x27   : > { %419 = vst.msk [vmem:[#allocation2] sm:$0xff] %vm418_vm1, %v416_v7  ;;  %s545_s23 = scalar_lea.hbm %s1107_s7, %s679_s17  ;;  %s534_s27 = scalar_lea.sflag [#allocation5], %s999_s10 }
  0x28   : > { %420 = vst.msk [vmem:[#allocation2 + $0x10] sm:$0xff] %vm418_vm1, %v417_v10  ;;  %s549_s11 = sshll.u32 %s545_s23, 4  ;;  %s816_s18 = scalar_lea.hbm %s1107_s7, 16  ;;  %s550_s11 = int_to_ptr.hbm [resolvable:$true] %s549_s11 }
  0x29   : > { %s810_s17 = sshra.s32 %s550_s11, 4  ;;  %s811_s17 = int_to_ptr.hbm [resolvable:$true] %s810_s17 }
  0x2a   : > { %p817_p8 = scmp.lt.s32.totalorder %s811_s17, %s1107_s7 }
  0x2d   : > { %755 = vset.pattern.permute.xlu1 %v883_v11 }
  0x97   : > { %v480_v20 = vpop.permute.xlu1 %479 }
  0x9f   : > { %v407_v13 = vpop.f32.mrf.mxu0 }
  0xa5   : > { %v410_v8 = vpop.f32.mrf.mxu2 }
  0xa6   : > { %423 = vrot.lane.b32.xlu0 %v410_v8, %s882_s21  ;;  %v442_v16 = vmul.f32 %v410_v8, %v407_v13 }
  0xa7   : > { %v413_v9 = vpop.f32.mrf.mxu3 }
  0xae   : > { %425 = vrot.lane.b32.xlu0 %v413_v9, %s882_s21  ;;  %s812_s21 = scalar_lea.hbm %s811_s17, 8 }
  0xaf   : > { %p813_p5 = scmp.ne.s32.totalorder %s811_s17, %s812_s21  ;;  %p818_p10 = scmp.lt.s32.totalorder %s816_s18, %s812_s21 }
  0xb1   : > { %p814_p6 = pnand %p813_p5, %p976_p9  ;;  %p819_p13 = por %p818_p10, %p817_p8 }
  0xb3   : > { %p815_p7 = pneg %p814_p6 }
  0xb5   : > { %p820_p0 = pnand %p819_p13, %p815_p7 }
  0xb6   : > { %474 = vperm.xlu0 %754, %v377_v4  }
  0xbe   : > { %756 = vset.pattern.permute.xlu0 %v883_v11 }
 0x118   : > { %v424_v12 = vpop.permute.xlu0 %423 }
 0x119   : > { %430 = vst.msk [vmem:[#allocation2] sm:$0xff] %vm429_vm2, %v424_v12 }
 0x11a   : > { %431 = vst.msk [vmem:[#allocation2 + $0x8] sm:$0xff] %vm418_vm1, %v424_v12 }
 0x11b   : > { %435 = vst.msk [vmem:[#allocation2 + $0x8] sm:$0xff] %vm434_vm3, %v416_v7 }
 0x120   : > { %v426_v14 = vpop.permute.xlu0 %425  ;;  %v437_v15 = vld [vmem:[#allocation2] sm:$0xff] }
 0x121   : > { %432 = vst.msk [vmem:[#allocation2 + $0x10] sm:$0xff] %vm429_vm2, %v426_v14  ;;  %445 = vrot.lane.b32.xlu1 %v437_v15, %s884_s22  ;;  %v441_v17 = vmul.f32 %v437_v15, %v407_v13 }
 0x122   : > { %433 = vst.msk [vmem:[#allocation2 + $0x18] sm:$0xff] %vm418_vm1, %v426_v14  ;;  %v439_v18 = vld [vmem:[#allocation2 + $0x8] sm:$0xff] }
 0x123   : > { %436 = vst.msk [vmem:[#allocation2 + $0x18] sm:$0xff] %vm434_vm3, %v417_v10  ;;  %v453_v19 = vmax.f32 %v441_v17, %v442_v16  ;;  %447 = vrot.lane.b32.xlu2 %v439_v18, %s884_s22 }
 0x128   : > { %v438_v21 = vld [vmem:[#allocation2 + $0x10] sm:$0xff]  ;;  %v475_v38 = vpop.permute.xlu0 %474 }
 0x129   : > { %v482_v22 = vadd.f32 %v480_v20, %v438_v21  ;;  %v477_v41 = vadd.f32 %v475_v38, %v413_v9 }
 0x12a   : > { %v440_v23 = vld [vmem:[#allocation2 + $0x18] sm:$0xff] }
 0x12b   : > { %469 = vperm.xlu2 %753, %v377_v4   ;;  %489 = vrot.lane.b32.xlu1 %v482_v22, %s884_s22  ;;  %v483_v24 = vadd.f32 %v480_v20, %v440_v23 }
 0x133   : > { %491 = vrot.lane.b32.xlu2 %v483_v24, %s884_s22  ;;  %501 = vperm.xlu1 %755, %v379_v29  }
 0x17d   : > { %v448_v25 = vpop.permute.xlu2 %447 }
 0x185   : > { %v470_v37 = vpop.permute.xlu2 %469 }
 0x186   : > { %v472_v39 = vadd.f32 %v470_v37, %v438_v21 }
 0x18d   : > { %v492_v46 = vpop.permute.xlu2 %491 }
 0x193   : > { %v446_v26 = vpop.permute.xlu1 %445 }
 0x194   : > { %v450_v27 = vsel %vm449_vm4, %v446_v26, %v448_v25 }
 0x195   : > { %v452_v28 = vmul.f32 %v450_v27, %v407_v13 }
 0x197   : > { %v454_v30 = vmax.f32 %v453_v19, %v452_v28 }
 0x199   : > { %v455_v31 = vsub.f32 %v441_v17, %v454_v30  ;;  %v458_v32 = vsub.f32 %v442_v16, %v454_v30  ;;  %v461_v33 = vsub.f32 %v452_v28, %v454_v30 }
 0x19b   : > { %v456_v34 = vmul.f32 1.442695, %v455_v31  ;;  %v459_v35 = vmul.f32 1.442695, %v458_v32  ;;  %v462_v36 = vmul.f32 1.442695, %v461_v33 }
 0x19d   : > { %758 = vpow2.f32 %v456_v34  ;;  %v490_v42 = vpop.permute.xlu1 %489 }
 0x19e   : > { %760 = vpow2.f32 %v459_v35  ;;  %v493_v49 = vsel %vm449_vm4, %v490_v42, %v492_v46 }
 0x19f   : > { %762 = vpow2.f32 %v462_v36 }
 0x1a3   : > { %v759_v40 = vpop.eup %758 }
 0x1a4   : > { %v761_v43 = vpop.eup %760  ;;  %v484_v44 = vmul.f32 %v759_v40, %v472_v39 }
 0x1a5   : > { %v763_v45 = vpop.eup %762  ;;  %v464_v47 = vadd.f32 %v761_v43, %v759_v40  ;;  %v485_v48 = vmul.f32 %v761_v43, %v477_v41  ;;  %v502_v58 = vpop.permute.xlu1 %501 }
 0x1a6   : > { %v495_v50 = vmul.f32 %v763_v45, %v493_v49 }
 0x1a7   : > { %v465_v51 = vadd.f32 %v763_v45, %v464_v47  ;;  %v486_v52 = vadd.f32 %v485_v48, %v484_v44 }
 0x1a9   : > { %764 = vrcp.f32 %v465_v51  ;;  %v496_v53 = vadd.f32 %v495_v50, %v486_v52 }
 0x1af   : > { %v765_v54 = vpop.eup %764 }
 0x1b0   : > { %v497_v55 = vmul.f32 %v765_v54, %v496_v53 }
 0x1b2   : > { %v498_v56 = vmax.f32 %v497_v55, 0.0 }
 0x1b4   : > { %522 = vmatpush.msra.mxu1 %v498_v56 }
 0x1b5   : > { %677 = vmatmul.msk.f32.vlgmr.msra.gmra.mxu1 %vm380_vm0, %v378_v57 }
 0x232   : > { %v524_v59 = vpop.f32.mrf.mxu1 }
 0x233   : > { %v525_v60 = vadd.f32 %v524_v59, %v502_v58 }
 0x235   : > { %v527_v62 = vadd.f32 %v525_v60, %v1009_v0 }
 0x237   : > { %v531_v63 = vmul.f32 %v757_v61, %v527_v62 }
 0x239   : > { %532 = vst [vmem:[%s356_s19] sm:$0xff] %v531_v63 }
 0x23a   : > { %823 = shalt.err (!%p820_p0)
}
 0x23b   : > { %687 = dma.vmem_to_hbm [thread:$0]  (%p976_p9), %s548_s20, 128, %s550_s11, %s534_s27  }
 0x23c PF: > { %s561_s10 = sand.u32 1, %s858_s24   ;;  %p694_p1 = pnand %p666_p12, %p983_p11 }
 0x23d   : > { %s562_s13 = scalar_lea.sflag [#allocation5], %s561_s10 }
 0x23e   : > { %p695_p2 = pneg %p694_p1 }
 0x240   : > { %853 = dma.done.wait (%p695_p2), %s562_s13, 128  }
 0x241   : > { %855 = vsyncadd (%p695_p2), %s562_s13, 4294967168  ;;  %s23_s29 = sadd.s32 1, %s878_s29   ;;  %s1112_s24 = smov %s862_s25 }
 0x242   : > { %p20_p3 = scmp.ge.s32.totalorder %s23_s29, 4   ;;  %s1113_s25 = smov %s866_s26 }
 0x243   : > { %s1114_s26 = smov %s981_s15  ;;  %s1115_s27 = smov %s874_s28 }
 0x244   : > { %s1116_s28 = smov %s1118_s9  ;;  %22 = sbr.rel (!%p20_p3) target bundleno = 6 (0x6), region = 99 }
 0x249   :  { %568 = vsyncpa [#allocation4], 1 }
 0x24a   :  { %570 = vsyncpa [#allocation4 + $0x1], 1 }
 0x24b   :  { %571 = vsyncpa [#allocation5], 1 }
 0x24c   :  { %573 = vsyncpa [#allocation5 + $0x1], 1 }

// kernel: tpu_custom_call.1
= control target key start
LH: loop header
LB: loop body
LE: loop exit
PB: predicated region body
PF: predicated region fallthrough
CT: control target
= control target key end

     0   :  { %12 = vsyncpa [#allocation4], 0  ;;  %s1100_s0 = inlined_call_operand.hbm [shape: f32[2,8,128], index: 0, kind: input, shape index: {}]   ;;  %s1101_s1 = inlined_call_operand.vmem [shape: f32[2,1,16,128], index: 1, kind: input, shape index: {}]   ;;  %s1102_s2 = inlined_call_operand.vmem [shape: f32[2,1,128], index: 2, kind: input, shape index: {}]   ;;  %s1103_s3 = inlined_call_operand.vmem [shape: f32[24,8], index: 3, kind: input, shape index: {}]   ;;  %s1104_s4 = inlined_call_operand.vmem [shape: f32[8,3], index: 4, kind: input, shape index: {}]   ;;  %s1105_s5 = inlined_call_operand.vmem [shape: f32[8,8], index: 5, kind: input, shape index: {}]   ;;  %s1106_s6 = inlined_call_operand.vmem [shape: f32[8,1], index: 6, kind: input, shape index: {}]   ;;  %s1107_s7 = inlined_call_operand.hbm [shape: f32[2,8,128], index: 7, kind: output, shape index: {}]  }
   0x1   :  { %14 = vsyncpa [#allocation4 + $0x1], 0 }
   0x2   :  { %15 = vsyncpa [#allocation5], 0 }
   0x3   :  { %17 = vsyncpa [#allocation5 + $0x1], 0  ;;  %s925_s24 = smov 0   ;;  %s927_s25 = smov 0  }
   0x4   :  { %s929_s26 = smov 0   ;;  %s931_s27 = smov 0  }
   0x5   :  { %s933_s28 = smov 0   ;;  %s935_s29 = smov 0  }
   0x6 LB: > { %s663_s30 = sadd.s32 4294967295, %s878_s29   ;;  %s664_s8 = sadd.s32 4294967294, %s878_s29   ;;  %s878_s29 = sphi %s935_s29, %s23_s29   ;;  %s874_s28 = sphi %s933_s28, %s1116_s28   ;;  %s870_s27 = sphi %s931_s27, %s1115_s27   ;;  %s866_s26 = sphi %s929_s26, %s1114_s26   ;;  %s862_s25 = sphi %s927_s25, %s1113_s25   ;;  %s858_s24 = sphi %s925_s24, %s1112_s24  }
   0x7   : > { %s35_s9 = sadd.s32 1, %s874_s28  ;;  %s44_s10 = sadd.s32 1, %s866_s26 }
   0x8   : > { %p37_p0 = scmp.ge.s32.totalorder %s35_s9, 2  ;;  %p51_p1 = scmp.ne.s32.totalorder %s866_s26, %s862_s25 }
   0x9   : > { %p52_p2 = scmp.eq.s32.totalorder %s878_s29, 0  ;;  %p57_p3 = scmp.ne.s32.totalorder %s862_s25, %s858_s24 }
   0xa   : > { %s1118_s9 = smov (%p37_p0, %s35_s9), 0  ;;  %p58_p5 = scmp.eq.s32.totalorder %s663_s30, 0 }
   0xb   : > { %p966_p4 = por %p52_p2, %p51_p1  ;;  %s39_s12 = ssub.s32 %s874_s28, %s1118_s9 }
   0xc   : > { %p223_p6 = scmp.eq.s32.totalorder %s663_s30, 1  ;;  %p42_p7 = scmp.eq.s32.totalorder %s39_s12, 0 }
   0xd   : > { %p972_p8 = por %p58_p5, %p57_p3  ;;  %p229_p10 = scmp.eq.s32.totalorder %s664_s8, 1 }
   0xe   : > { %p976_p9 = por %p223_p6, %p51_p1  ;;  %p666_p12 = scmp.ge.s32.totalorder %s878_s29, 2 }
   0xf   : > { %s981_s15 = scalar_select %p42_p7, %s866_s26, %s44_s10  }
  0x10   : > { %p983_p11 = por %p229_p10, %p57_p3  ;;  %p697_p13 = scmp.lt.s32.totalorder %s878_s29, 2 }
  0x11   : > { %s261_s17 = sand.u32 1, %s866_s26   ;;  %s668_s19 = sshll.u32 %s874_s28, 3 }
  0x12   : > { %s667_s18 = sshll.u32 %s261_s17, 3  ;;  %s270_s22 = scalar_lea.hbm %s1100_s0, %s668_s19 }
  0x13   : > { %s265_s23 = scalar_lea.vmem [#allocation3], %s667_s18  ;;  %s272_s12 = sshll.u32 %s270_s22, 4  ;;  %s273_s12 = int_to_ptr.hbm [resolvable:$true] %s272_s12 }
  0x14   : > { %s274_s30 = sshll.u32 %s265_s23, 4  ;;  %p690_p0 = pnand %p697_p13, %p966_p4  ;;  %s275_s30 = int_to_ptr.vmem [resolvable:$true] %s274_s30 }
  0x15   : > { %p669_p1 = scmp.ge.s32.totalorder %s878_s29, 1  ;;  %p300_p2 = scmp.lt.s32.totalorder %s878_s29, 3 }
  0x16   : > { %s262_s8 = scalar_lea.sflag [#allocation4], %s261_s17 }
  0x17   : > { %692 = dma.hbm_to_vmem [thread:$0]  (!%p690_p0), %s273_s12, 128, %s275_s30, %s262_s8  }
  0x18   : > { %p301_p3 = pnand %p669_p1, %p300_p2 }
  0x19   : > { %s999_s10 = sand.u32 (!%p301_p3), 1, %s862_s25  }
  0x1a   : > { %304 = sbr.rel (%p301_p3) target bundleno = 572 (0x23c), region = 48  ;;  %s670_s18 = sshll.u32 (!%p301_p3), %s999_s10, 3 }
  0x1b   : > { %s307_s19 = scalar_lea.sflag (!%p301_p3), [#allocation4], %s999_s10  ;;  %s310_s20 = scalar_lea.vmem (!%p301_p3), [#allocation3], %s670_s18 }
  0x1f   : > { %849 = dma.done.wait (%p972_p8), %s307_s19, 128  }
  0x20   : > { %851 = vsyncadd (%p972_p8), %s307_s19, 4294967168  ;;  %vm380_vm0 = vcmask 64512   ;;  %v1009_v0 = vld [vmem:[%s310_s20] sm:$0xff]  ;;  %v376_v3 = vld [vmem:[%s1103_s3 + $0x10] sm:$0xff]  ;;  %p357_p4 = scmp.lt.s32.totalorder %s870_s27, 1  ;;  %v880_v5 = vmov 2  }
  0x21   : > { %v375_v1 = vld [vmem:[%s1103_s3 + $0x8] sm:$0xff]  ;;  %v374_v2 = vld [vmem:[%s1103_s3] sm:$0xff]  ;;  %683 = vmatpush.msra.mxu2 %v1009_v0  ;;  %405 = vmatpush.msra.mxu0 %v1009_v0  ;;  %v881_v6 = vmov 1   ;;  %vm418_vm1 = vcmask 7168   ;;  %s882_s21 = smov 1   ;;  %v883_v11 = vmov 0  }
  0x22   : > { %675 = vmatmul.msk.f32.vlgmr.msra.gmra.mxu2 %vm380_vm0, %v375_v1  ;;  %674 = vmatmul.msk.f32.vlgmr.msra.gmra.mxu0 %vm380_vm0, %v374_v2  ;;  %s1028_s30 = scalar_select %p357_p4, %s870_s27, 1  ;;  %v377_v4 = vld [vmem:[%s1104_s4] sm:$0xff]  ;;  %vm429_vm2 = vcmask 1047560   ;;  %vm434_vm3 = vcmask 15368   ;;  %vm449_vm4 = vcmask 1031168  }
  0x23   : > { %684 = vmatpush.msra.mxu3 %v1009_v0  ;;  %752 = vset.pattern.permute.xlu1 %v880_v5  ;;  %s884_s22 = smov 126   ;;  %v379_v29 = vld [vmem:[%s1106_s6] sm:$0xff] }
  0x24   : > { %676 = vmatmul.msk.f32.vlgmr.msra.gmra.mxu3 %vm380_vm0, %v376_v3  ;;  %754 = vset.pattern.permute.xlu0 %v881_v6  ;;  %s682_s19 = sshll.u32 %s1028_s30, 4  ;;  %s371_s12 = scalar_lea.vmem %s1102_s2, %s1028_s30  ;;  %v378_v57 = vld [vmem:[%s1105_s5] sm:$0xff] }
  0x25   : > { %479 = vperm.xlu1 %752, %v377_v4   ;;  %s365_s17 = scalar_lea.vmem %s1101_s1, %s682_s19  ;;  %753 = vset.pattern.permute.xlu2 %v883_v11  ;;  %v757_v61 = vld [vmem:[%s371_s12] ss:$0 sm:$0xff]  ;;  %s356_s19 = scalar_lea.vmem [#allocation6], %s670_s18 }
  0x26   : > { %v416_v7 = vld [vmem:[%s365_s17] sm:$0xff]  ;;  %v417_v10 = vld [vmem:[%s365_s17 + $0x8] sm:$0xff]  ;;  %s679_s17 = sshll.u32 %s870_s27, 3  ;;  %s547_s20 = sshll.u32 %s356_s19, 4  ;;  %s548_s20 = int_to_ptr.vmem [resolvable:$true] %s547_s20 }
  0x27   : > { %419 = vst.msk [vmem:[#allocation2] sm:$0xff] %vm418_vm1, %v416_v7  ;;  %s545_s23 = scalar_lea.hbm %s1107_s7, %s679_s17  ;;  %s534_s27 = scalar_lea.sflag [#allocation5], %s999_s10 }
  0x28   : > { %420 = vst.msk [vmem:[#allocation2 + $0x10] sm:$0xff] %vm418_vm1, %v417_v10  ;;  %s549_s11 = sshll.u32 %s545_s23, 4  ;;  %s816_s18 = scalar_lea.hbm %s1107_s7, 16  ;;  %s550_s11 = int_to_ptr.hbm [resolvable:$true] %s549_s11 }
  0x29   : > { %s810_s17 = sshra.s32 %s550_s11, 4  ;;  %s811_s17 = int_to_ptr.hbm [resolvable:$true] %s810_s17 }
  0x2a   : > { %p817_p8 = scmp.lt.s32.totalorder %s811_s17, %s1107_s7 }
  0x2d   : > { %755 = vset.pattern.permute.xlu1 %v883_v11 }
  0x97   : > { %v480_v20 = vpop.permute.xlu1 %479 }
  0x9f   : > { %v407_v13 = vpop.f32.mrf.mxu0 }
  0xa5   : > { %v410_v8 = vpop.f32.mrf.mxu2 }
  0xa6   : > { %423 = vrot.lane.b32.xlu0 %v410_v8, %s882_s21  ;;  %v442_v16 = vmul.f32 %v410_v8, %v407_v13 }
  0xa7   : > { %v413_v9 = vpop.f32.mrf.mxu3 }
  0xae   : > { %425 = vrot.lane.b32.xlu0 %v413_v9, %s882_s21  ;;  %s812_s21 = scalar_lea.hbm %s811_s17, 8 }
  0xaf   : > { %p813_p5 = scmp.ne.s32.totalorder %s811_s17, %s812_s21  ;;  %p818_p10 = scmp.lt.s32.totalorder %s816_s18, %s812_s21 }
  0xb1   : > { %p814_p6 = pnand %p813_p5, %p976_p9  ;;  %p819_p13 = por %p818_p10, %p817_p8 }
  0xb3   : > { %p815_p7 = pneg %p814_p6 }
  0xb5   : > { %p820_p0 = pnand %p819_p13, %p815_p7 }
  0xb6   : > { %474 = vperm.xlu0 %754, %v377_v4  }
  0xbe   : > { %756 = vset.pattern.permute.xlu0 %v883_v11 }
 0x118   : > { %v424_v12 = vpop.permute.xlu0 %423 }
 0x119   : > { %430 = vst.msk [vmem:[#allocation2] sm:$0xff] %vm429_vm2, %v424_v12 }
 0x11a   : > { %431 = vst.msk [vmem:[#allocation2 + $0x8] sm:$0xff] %vm418_vm1, %v424_v12 }
 0x11b   : > { %435 = vst.msk [vmem:[#allocation2 + $0x8] sm:$0xff] %vm434_vm3, %v416_v7 }
 0x120   : > { %v426_v14 = vpop.permute.xlu0 %425  ;;  %v437_v15 = vld [vmem:[#allocation2] sm:$0xff] }
 0x121   : > { %432 = vst.msk [vmem:[#allocation2 + $0x10] sm:$0xff] %vm429_vm2, %v426_v14  ;;  %445 = vrot.lane.b32.xlu1 %v437_v15, %s884_s22  ;;  %v441_v17 = vmul.f32 %v437_v15, %v407_v13 }
 0x122   : > { %433 = vst.msk [vmem:[#allocation2 + $0x18] sm:$0xff] %vm418_vm1, %v426_v14  ;;  %v439_v18 = vld [vmem:[#allocation2 + $0x8] sm:$0xff] }
 0x123   : > { %436 = vst.msk [vmem:[#allocation2 + $0x18] sm:$0xff] %vm434_vm3, %v417_v10  ;;  %v453_v19 = vmax.f32 %v441_v17, %v442_v16  ;;  %447 = vrot.lane.b32.xlu2 %v439_v18, %s884_s22 }
 0x128   : > { %v438_v21 = vld [vmem:[#allocation2 + $0x10] sm:$0xff]  ;;  %v475_v38 = vpop.permute.xlu0 %474 }
 0x129   : > { %v482_v22 = vadd.f32 %v480_v20, %v438_v21  ;;  %v477_v41 = vadd.f32 %v475_v38, %v413_v9 }
 0x12a   : > { %v440_v23 = vld [vmem:[#allocation2 + $0x18] sm:$0xff] }
 0x12b   : > { %469 = vperm.xlu2 %753, %v377_v4   ;;  %489 = vrot.lane.b32.xlu1 %v482_v22, %s884_s22  ;;  %v483_v24 = vadd.f32 %v480_v20, %v440_v23 }
 0x133   : > { %491 = vrot.lane.b32.xlu2 %v483_v24, %s884_s22  ;;  %501 = vperm.xlu1 %755, %v379_v29  }
 0x17d   : > { %v448_v25 = vpop.permute.xlu2 %447 }
 0x185   : > { %v470_v37 = vpop.permute.xlu2 %469 }
 0x186   : > { %v472_v39 = vadd.f32 %v470_v37, %v438_v21 }
 0x18d   : > { %v492_v46 = vpop.permute.xlu2 %491 }
 0x193   : > { %v446_v26 = vpop.permute.xlu1 %445 }
 0x194   : > { %v450_v27 = vsel %vm449_vm4, %v446_v26, %v448_v25 }
 0x195   : > { %v452_v28 = vmul.f32 %v450_v27, %v407_v13 }
 0x197   : > { %v454_v30 = vmax.f32 %v453_v19, %v452_v28 }
 0x199   : > { %v455_v31 = vsub.f32 %v441_v17, %v454_v30  ;;  %v458_v32 = vsub.f32 %v442_v16, %v454_v30  ;;  %v461_v33 = vsub.f32 %v452_v28, %v454_v30 }
 0x19b   : > { %v456_v34 = vmul.f32 1.442695, %v455_v31  ;;  %v459_v35 = vmul.f32 1.442695, %v458_v32  ;;  %v462_v36 = vmul.f32 1.442695, %v461_v33 }
 0x19d   : > { %758 = vpow2.f32 %v456_v34  ;;  %v490_v42 = vpop.permute.xlu1 %489 }
 0x19e   : > { %760 = vpow2.f32 %v459_v35  ;;  %v493_v49 = vsel %vm449_vm4, %v490_v42, %v492_v46 }
 0x19f   : > { %762 = vpow2.f32 %v462_v36 }
 0x1a3   : > { %v759_v40 = vpop.eup %758 }
 0x1a4   : > { %v761_v43 = vpop.eup %760  ;;  %v484_v44 = vmul.f32 %v759_v40, %v472_v39 }
 0x1a5   : > { %v763_v45 = vpop.eup %762  ;;  %v464_v47 = vadd.f32 %v761_v43, %v759_v40  ;;  %v485_v48 = vmul.f32 %v761_v43, %v477_v41  ;;  %v502_v58 = vpop.permute.xlu1 %501 }
 0x1a6   : > { %v495_v50 = vmul.f32 %v763_v45, %v493_v49 }
 0x1a7   : > { %v465_v51 = vadd.f32 %v763_v45, %v464_v47  ;;  %v486_v52 = vadd.f32 %v485_v48, %v484_v44 }
 0x1a9   : > { %764 = vrcp.f32 %v465_v51  ;;  %v496_v53 = vadd.f32 %v495_v50, %v486_v52 }
 0x1af   : > { %v765_v54 = vpop.eup %764 }
 0x1b0   : > { %v497_v55 = vmul.f32 %v765_v54, %v496_v53 }
 0x1b2   : > { %v498_v56 = vmax.f32 %v497_v55, 0.0 }
 0x1b4   : > { %522 = vmatpush.msra.mxu1 %v498_v56 }
 0x1b5   : > { %677 = vmatmul.msk.f32.vlgmr.msra.gmra.mxu1 %vm380_vm0, %v378_v57 }
 0x232   : > { %v524_v59 = vpop.f32.mrf.mxu1 }
 0x233   : > { %v525_v60 = vadd.f32 %v524_v59, %v502_v58 }
 0x235   : > { %v527_v62 = vadd.f32 %v525_v60, %v1009_v0 }
 0x237   : > { %v531_v63 = vmul.f32 %v757_v61, %v527_v62 }
 0x239   : > { %532 = vst [vmem:[%s356_s19] sm:$0xff] %v531_v63 }
 0x23a   : > { %823 = shalt.err (!%p820_p0)
}
 0x23b   : > { %687 = dma.vmem_to_hbm [thread:$0]  (%p976_p9), %s548_s20, 128, %s550_s11, %s534_s27  }
 0x23c PF: > { %s561_s10 = sand.u32 1, %s858_s24   ;;  %p694_p1 = pnand %p666_p12, %p983_p11 }
 0x23d   : > { %s562_s13 = scalar_lea.sflag [#allocation5], %s561_s10 }
 0x23e   : > { %p695_p2 = pneg %p694_p1 }
 0x240   : > { %853 = dma.done.wait (%p695_p2), %s562_s13, 128  }
 0x241   : > { %855 = vsyncadd (%p695_p2), %s562_s13, 4294967168  ;;  %s23_s29 = sadd.s32 1, %s878_s29   ;;  %s1112_s24 = smov %s862_s25 }
 0x242   : > { %p20_p3 = scmp.ge.s32.totalorder %s23_s29, 4   ;;  %s1113_s25 = smov %s866_s26 }
 0x243   : > { %s1114_s26 = smov %s981_s15  ;;  %s1115_s27 = smov %s874_s28 }
 0x244   : > { %s1116_s28 = smov %s1118_s9  ;;  %22 = sbr.rel (!%p20_p3) target bundleno = 6 (0x6), region = 99 }
 0x249   :  { %568 = vsyncpa [#allocation4], 1 }
 0x24a   :  { %570 = vsyncpa [#allocation4 + $0x1], 1 }
 0x24b   :  { %571 = vsyncpa [#allocation5], 1 }
 0x24c   :  { %573 = vsyncpa [#allocation5 + $0x1], 1 }

</bundles_post_ra>
